<compile_context>
chip_gen: v7x
topology: tpu7x:2x2x1
jax: 0.10.0
libtpu: 0.0.40
codegen_flags: <defaults>
</compile_context>

<pallas_src>
import numpy as np
import jax
import jax.numpy as jnp
from jax.experimental import pallas as pl
from jax.experimental.pallas import tpu as pltpu

BN_EPS = 1e-5


# ----------------------------------------------------------------------------
# Pallas kernel: one batch tile of TILE_N columns (batch on lanes).
# ----------------------------------------------------------------------------
def deepfm_kernel(x_ref, w_ref, gt_ref, const_ref, out_ref):
    F = w_ref.shape[1] - gt_ref.shape[1]          # number of fields
    E = gt_ref.shape[0]                           # embedding size

    # Upcast the bf16 stream once; all math below is f32 (exact FM cancellation).
    x = x_ref[...].astype(jnp.float32)            # (F + F*E, T)  = [p1 ; e2s]
    e2s = x[F:, :]                                # (F*E, T), sublane-aligned view

    # One MXU matmul: row 0 = fm1_mean + folded deep branch, rows 1..E = field sums.
    a = jnp.dot(w_ref[...], x, preferred_element_type=jnp.float32)   # (1+E, T)
    lin = a[:1, :]                                # (1, T)
    s = a[1:, :]                                  # (E, T)

    # FM second order: 0.5 * mean_e( s_e^2 - sum_f x_{f,e}^2 ).
    # The sum over fields of x^2 runs on the (idle) MXU via G^T; only an E=4
    # sublane reduce remains on the XLU.
    sq = jnp.dot(gt_ref[...], e2s * e2s, preferred_element_type=jnp.float32)  # (E, T)
    fm2 = (0.5 / E) * jnp.sum(s * s - sq, axis=0, keepdims=True)              # (1, T)

    out_ref[...] = lin + fm2 + const_ref[0, 0]


# ----------------------------------------------------------------------------
# Wrapper glue: gathers + pre-scaling, weight folding, batch tiling.
# ----------------------------------------------------------------------------
def _round_up(x, m):
    return pl.cdiv(x, m) * m


def _gather_scaled_inputs(Xi, Xv, emb1_tables, emb2_tables):
    """Per-field gathers pre-scaled by Xv, stacked feature-major (XLA glue).

    Returns X of shape (F + F*E, N) in bf16: rows [0, F) are e1*xv, rows
    [F, F+F*E) are the field-major flattened e2*xv (row F + f*E + e).
    """
    N, F, _ = Xi.shape
    idx = Xi[:, :, 0]                                                  # (N, F)
    p1 = jnp.stack(
        [emb1_tables[i][idx[:, i], 0] * Xv[:, i] for i in range(F)], axis=0)       # (F, N)
    e2s = jnp.concatenate(
        [(emb2_tables[i][idx[:, i]] * Xv[:, i:i + 1]).T for i in range(F)], axis=0)  # (F*E, N)
    return jnp.concatenate([p1, e2s], axis=0).astype(jnp.bfloat16)     # (F + F*E, N)


def _fold_deep_params(w1, b1, g1, be1, rm1, rv1,
                      w2, b2, g2, be2, rm2, rv2, bias, eps=BN_EPS):
    """Fold Linear->BN(eval)->Dropout(id) x2 + mean(H2) into (wfold, const).

    No nonlinearity exists between the layers, so in eval mode:
        mean_h2(BN2(BN1(x @ W1 + b1) @ W2 + b2)) == x @ wfold + cdeep   (exact)
    """
    scale1 = g1 / jnp.sqrt(rv1 + eps)
    shift1 = be1 - rm1 * scale1
    w1p = w1 * scale1[None, :]                      # (F*E, H1)
    b1p = b1 * scale1 + shift1                      # (H1,)

    scale2 = g2 / jnp.sqrt(rv2 + eps)
    shift2 = be2 - rm2 * scale2
    w2p = w2 * scale2[None, :]                      # (H1, H2)
    b2p = b2 * scale2 + shift2                      # (H2,)

    w2vec = jnp.mean(w2p, axis=1)                   # (H1,)  == W2' @ ones / H2
    wfold = w1p @ w2vec                             # (F*E,)
    cdeep = jnp.dot(b1p, w2vec) + jnp.mean(b2p)     # scalar
    const = cdeep + bias[0]                         # fold FM bias too
    return wfold.astype(jnp.float32), jnp.reshape(const, (1, 1)).astype(jnp.float32)


def deepfm_forward(Xi, Xv, emb1_tables, emb2_tables,
                   w1, b1, g1, be1, rm1, rv1,
                   w2, b2, g2, be2, rm2, rv2, bias, *, tile_n=8192):
    N, F, _ = Xi.shape
    E = emb2_tables[0].shape[1]
    FE = F * E

    # Fused, pre-scaled, feature-major bf16 stream.
    x = _gather_scaled_inputs(Xi, Xv, emb1_tables, emb2_tables)        # (F+FE, N)

    # Constants (resident in VMEM across the grid).
    wfold, const = _fold_deep_params(w1, b1, g1, be1, rm1, rv1,
                                     w2, b2, g2, be2, rm2, rv2, bias)
    gT = jnp.tile(jnp.eye(E, dtype=jnp.float32), (1, F))               # (E, FE)
    row0 = jnp.concatenate([jnp.full((1, F), 1.0 / F, jnp.float32),
                            wfold.reshape(1, FE)], axis=1)             # (1, F+FE)
    rows = jnp.concatenate([jnp.zeros((E, F), jnp.float32), gT], axis=1)
    W = jnp.concatenate([row0, rows], axis=0)                          # (1+E, F+FE)

    # Batch tiling: lane-dense tiles (multiple of 128), capped at ceil(N/2) so the
    # "parallel" grid always has >=2 steps (v7x dual-TC sharding); n_pad columns
    # beyond N produce `const` and are sliced off below.
    cap = int(_round_up(pl.cdiv(N, 2), 128))
    tile = max(128, min(int(_round_up(int(tile_n), 128)), cap))
    n_pad = int(_round_up(N, tile))
    if n_pad != N:
        x = jnp.pad(x, ((0, 0), (0, n_pad - N)))

    out = pl.pallas_call(
        deepfm_kernel,
        grid=(n_pad // tile,),
        in_specs=[
            pl.BlockSpec((F + FE, tile), lambda i: (0, i)),        # fused [p1; e2s] stream
            pl.BlockSpec((1 + E, F + FE), lambda i: (0, 0)),       # [1/F|wfold ; 0|G^T]
            pl.BlockSpec((E, FE), lambda i: (0, 0)),               # G^T (square-sum matmul)
            pl.BlockSpec(memory_space=pltpu.MemorySpace.SMEM),     # folded scalar const
        ],
        out_specs=pl.BlockSpec((1, tile), lambda i: (0, i)),
        out_shape=jax.ShapeDtypeStruct((1, n_pad), jnp.float32),
        compiler_params=pltpu.CompilerParams(
            dimension_semantics=("parallel",)),
    )(x, W, gT, const)

    return out[0, :N]


# ----------------------------------------------------------------------------
# Pure-JAX reference mirroring the PyTorch forward (eval mode).
# It consumes the same bf16-quantized pre-scaled inputs the kernel streams, so
# the check isolates the kernel math (the only deliberate deviation from the
# f32 torch model is the bf16 cast of the scaled embeddings).
# ----------------------------------------------------------------------------
def deepfm_reference(p1, e2s_flat,
                     w1, b1, g1, be1, rm1, rv1,
                     w2, b2, g2, be2, rm2, rv2, bias, eps=BN_EPS):
    N, FE = e2s_flat.shape
    F = p1.shape[1]
    E = FE // F

    fm1 = p1.mean(axis=1)                               # (N,)
    e2s = e2s_flat.reshape(N, F, E)                     # (N, F, E)
    s = e2s.sum(axis=1)                                 # (N, E)
    ss = (e2s * e2s).sum(axis=1)                        # (N, E)
    fm2 = (0.5 * (s * s - ss)).mean(axis=1)             # (N,)

    h = e2s_flat @ w1 + b1
    h = (h - rm1) / jnp.sqrt(rv1 + eps) * g1 + be1      # BN1 (eval), dropout = id
    h2 = h @ w2 + b2
    h2 = (h2 - rm2) / jnp.sqrt(rv2 + eps) * g2 + be2    # BN2 (eval), dropout = id

    return fm1 + fm2 + h2.mean(axis=1) + bias[0]


if __name__ == "__main__":
    key = jax.random.PRNGKey(0)

    feature_sizes = [11, 7, 23, 5, 19, 13, 9, 17]       # per-field vocab sizes
    F = len(feature_sizes)
    E = 4                                               # embedding_size
    H1, H2 = 32, 32                                     # hidden_dims
    N = 300                                             # batch (spans 2 grid tiles)

    ks = iter(jax.random.split(key, 40))
    emb1_tables = [jax.random.normal(next(ks), (fs, 1), jnp.float32)
                   for fs in feature_sizes]
    emb2_tables = [jax.random.normal(next(ks), (fs, E), jnp.float32)
                   for fs in feature_sizes]

    w1 = 0.1 * jax.random.normal(next(ks), (F * E, H1), jnp.float32)
    b1 = 0.1 * jax.random.normal(next(ks), (H1,), jnp.float32)
    w2 = 0.1 * jax.random.normal(next(ks), (H1, H2), jnp.float32)
    b2 = 0.1 * jax.random.normal(next(ks), (H2,), jnp.float32)
    bias = jax.random.normal(next(ks), (1,), jnp.float32)

    # BatchNorm (eval mode) with non-trivial affine + running stats to exercise
    # the weight folding (PyTorch construction defaults would be 1/0/0/1).
    g1 = 1.0 + 0.1 * jax.random.normal(next(ks), (H1,), jnp.float32)
    be1 = 0.1 * jax.random.normal(next(ks), (H1,), jnp.float32)
    rm1 = 0.1 * jax.random.normal(next(ks), (H1,), jnp.float32)
    rv1 = 1.0 + 0.1 * jax.random.uniform(next(ks), (H1,), jnp.float32)
    g2 = 1.0 + 0.1 * jax.random.normal(next(ks), (H2,), jnp.float32)
    be2 = 0.1 * jax.random.normal(next(ks), (H2,), jnp.float32)
    rm2 = 0.1 * jax.random.normal(next(ks), (H2,), jnp.float32)
    rv2 = 1.0 + 0.1 * jax.random.uniform(next(ks), (H2,), jnp.float32)

    # Inputs: Xi (N, F, 1) int indices, Xv (N, F) float values.
    xi_key = next(ks)
    Xi = jnp.stack(
        [jax.random.randint(jax.random.fold_in(xi_key, i), (N,), 0,
                            feature_sizes[i], dtype=jnp.int32)
         for i in range(F)], axis=1)[:, :, None]
    Xv = jax.random.uniform(next(ks), (N, F), jnp.float32)

    out = deepfm_forward(Xi, Xv, emb1_tables, emb2_tables,
                         w1, b1, g1, be1, rm1, rv1,
                         w2, b2, g2, be2, rm2, rv2, bias)
    out = jax.block_until_ready(out)

    # Reference consumes the same bf16-quantized pre-scaled stream.
    X = _gather_scaled_inputs(Xi, Xv, emb1_tables, emb2_tables)
    p1_q = X[:F, :].T.astype(jnp.float32)               # (N, F)
    e2s_q = X[F:, :].T.astype(jnp.float32)              # (N, F*E)
    ref = deepfm_reference(p1_q, e2s_q,
                           w1, b1, g1, be1, rm1, rv1,
                           w2, b2, g2, be2, rm2, rv2, bias)

    np.testing.assert_allclose(np.asarray(out), np.asarray(ref),
                               rtol=2e-3, atol=2e-3)
    print("KERNEL_OK")
</pallas_src>

<mosaic_0001>
module attributes {stable_mosaic.version = 11 : i64} {
  func.func @deepfm_kernel(%arg0: i32, %arg1: memref<40x256xbf16, #tpu.memory_space<vmem>>, %arg2: memref<5x40xf32, #tpu.memory_space<vmem>>, %arg3: memref<4x32xf32, #tpu.memory_space<vmem>>, %arg4: memref<1x1xf32, #tpu.memory_space<smem>>, %arg5: memref<1x256xf32, #tpu.memory_space<vmem>>) attributes {dimension_semantics = [#tpu.dimension_semantics<parallel>], iteration_bounds = array<i64: 2>, scalar_prefetch = 0 : i64, scratch_operands = 0 : i64, tpu.core_type = #tpu.core_type<tc>, window_params = [{transform_indices = @transform_0, window_bounds = array<i64: 40, 256>}, {pipeline_mode = #tpu.pipeline_mode<synchronous>, transform_indices = @transform_1, window_bounds = array<i64: 5, 40>}, {pipeline_mode = #tpu.pipeline_mode<synchronous>, transform_indices = @transform_2, window_bounds = array<i64: 4, 32>}, {transform_indices = @transform_3, window_bounds = array<i64: 1, 1>}, {transform_indices = @transform_4, window_bounds = array<i64: 1, 256>}]} {
    %c0 = arith.constant 0 : index
    %c0_0 = arith.constant 0 : index
    %0 = vector.load %arg1[%c0, %c0_0] : memref<40x256xbf16, #tpu.memory_space<vmem>>, vector<40x256xbf16>
    %1 = arith.extf %0 : vector<40x256xbf16> to vector<40x256xf32>
    %2 = vector.extract_strided_slice %1 {offsets = [8, 0], sizes = [32, 256], strides = [1, 1]} : vector<40x256xf32> to vector<32x256xf32>
    %c0_1 = arith.constant 0 : index
    %c0_2 = arith.constant 0 : index
    %3 = vector.load %arg2[%c0_1, %c0_2] : memref<5x40xf32, #tpu.memory_space<vmem>>, vector<5x40xf32>
    %cst = arith.constant dense<0.000000e+00> : vector<5x256xf32>
    %4 = tpu.matmul %3, %1, %cst {dimension_numbers = #tpu.dot_dimension_numbers<[1], [0], [0], [1], [0, 0, 1, 1], [], []>} : vector<5x40xf32>, vector<40x256xf32>, vector<5x256xf32> -> vector<5x256xf32>
    %5 = vector.extract_strided_slice %4 {offsets = [0, 0], sizes = [1, 256], strides = [1, 1]} : vector<5x256xf32> to vector<1x256xf32>
    %6 = vector.extract_strided_slice %4 {offsets = [1, 0], sizes = [4, 256], strides = [1, 1]} : vector<5x256xf32> to vector<4x256xf32>
    %c0_3 = arith.constant 0 : index
    %c0_4 = arith.constant 0 : index
    %7 = vector.load %arg3[%c0_3, %c0_4] : memref<4x32xf32, #tpu.memory_space<vmem>>, vector<4x32xf32>
    %8 = arith.mulf %2, %2 : vector<32x256xf32>
    %cst_5 = arith.constant dense<0.000000e+00> : vector<4x256xf32>
    %9 = tpu.matmul %7, %8, %cst_5 {dimension_numbers = #tpu.dot_dimension_numbers<[1], [0], [0], [1], [0, 0, 1, 1], [], []>} : vector<4x32xf32>, vector<32x256xf32>, vector<4x256xf32> -> vector<4x256xf32>
    %10 = arith.mulf %6, %6 : vector<4x256xf32>
    %11 = arith.subf %10, %9 : vector<4x256xf32>
    %cst_6 = arith.constant dense<0.000000e+00> : vector<256xf32>
    %12 = vector.multi_reduction <add>, %11, %cst_6 [0] : vector<4x256xf32> to vector<256xf32>
    %13 = vector.shape_cast %12 : vector<256xf32> to vector<1x256xf32>
    %cst_7 = arith.constant 1.250000e-01 : f32
    %14 = vector.broadcast %cst_7 : f32 to vector<1x256xf32>
    %15 = arith.mulf %14, %13 : vector<1x256xf32>
    %16 = arith.addf %5, %15 : vector<1x256xf32>
    %c0_8 = arith.constant 0 : index
    %c0_9 = arith.constant 0 : index
    %17 = memref.load %arg4[%c0_8, %c0_9] : memref<1x1xf32, #tpu.memory_space<smem>>
    %18 = vector.broadcast %17 : f32 to vector<1x256xf32>
    %19 = arith.addf %16, %18 : vector<1x256xf32>
    %c0_10 = arith.constant 0 : index
    %c0_11 = arith.constant 0 : index
    %20 = vector.load %arg5[%c0_10, %c0_11] : memref<1x256xf32, #tpu.memory_space<vmem>>, vector<1x256xf32>
    tpu.vector_store %arg5[%c0_10, %c0_11], %19 {strides = array<i32>} : memref<1x256xf32, #tpu.memory_space<vmem>>, vector<1x256xf32>,
    return
  }
  func.func @transform_0(%arg0: i32) -> (i32, i32) {
    %c0_i32 = arith.constant 0 : i32
    %c0_i32_0 = arith.constant 0 : i32
    return %c0_i32, %arg0 : i32, i32
  }
  func.func @transform_1(%arg0: i32) -> (i32, i32) {
    %c0_i32 = arith.constant 0 : i32
    %c0_i32_0 = arith.constant 0 : i32
    %c0_i32_1 = arith.constant 0 : i32
    return %c0_i32, %c0_i32_0 : i32, i32
  }
  func.func @transform_2(%arg0: i32) -> (i32, i32) {
    %c0_i32 = arith.constant 0 : i32
    %c0_i32_0 = arith.constant 0 : i32
    %c0_i32_1 = arith.constant 0 : i32
    return %c0_i32, %c0_i32_0 : i32, i32
  }
  func.func @transform_3(%arg0: i32) -> (i32, i32) {
    %c0_i32 = arith.constant 0 : i32
    %c0_i32_0 = arith.constant 0 : i32
    %c0_i32_1 = arith.constant 0 : i32
    return %c0_i32, %c0_i32_0 : i32, i32
  }
  func.func @transform_4(%arg0: i32) -> (i32, i32) {
    %c0_i32 = arith.constant 0 : i32
    %c0_i32_0 = arith.constant 0 : i32
    return %c0_i32, %arg0 : i32, i32
  }
}

</mosaic_0001>

<bundles_post_ra>
// kernel: tpu_custom_call.1
= control target key start
LH: loop header
LB: loop body
LE: loop exit
PB: predicated region body
PF: predicated region fallthrough
CT: control target
= control target key end

     0   :  { %s1036_s0 = inlined_call_operand.hbm [shape: bf16[40,512], index: 0, kind: input, shape index: {}]   ;;  %s1037_s1 = inlined_call_operand.hbm [shape: f32[5,40], index: 1, kind: input, shape index: {}]   ;;  %s1038_s2 = inlined_call_operand.vmem [shape: f32[4,32], index: 2, kind: input, shape index: {}]   ;;  %s1039_s3 = inlined_call_operand.<no memory space> [shape: f32[1,1], index: 3, kind: input, shape index: {}]   ;;  %s1040_s4 = inlined_call_operand.hbm [shape: f32[1,512], index: 4, kind: output, shape index: {}]  }
   0x1   :  { %9 = sst [smem:[#allocation2]] %s1039_s3 }
   0x2   :  { %10 = vsyncpa [#allocation4], 0 }
   0x3   :  { %12 = vsyncpa [#allocation4 + $0x1], 0 }
   0x4   :  { %13 = vsyncpa [#allocation7], 0 }
   0x5   :  { %14 = vsyncpa [#allocation5], 0 }
   0x6   :  { %16 = vsyncpa [#allocation5 + $0x1], 0  ;;  %s836_s17 = smov 0   ;;  %s838_s18 = smov 0  }
   0x7   :  { %s840_s19 = smov 0   ;;  %s842_s20 = smov 0  }
   0x8 LB: > { %s857_s3 = sadd.s32 4294967295, %s798_s20   ;;  %s564_s21 = sadd.s32 4294967294, %s798_s20   ;;  %s798_s20 = sphi %s842_s20, %s1065_s20   ;;  %s794_s19 = sphi %s840_s19, %s1064_s19   ;;  %s790_s18 = sphi %s838_s18, %s1063_s18   ;;  %s786_s17 = sphi %s836_s17, %s1062_s17  }
   0x9   : > { %s861_s22 = sadd.s32 1, %s798_s20   ;;  %s29_s23 = sadd.s32 1, %s794_s19 }
   0xa   : > { %s26_s24 = ssub.s32 %s798_s20, %s861_s22  ;;  %p36_p0 = scmp.ne.s32.totalorder %s794_s19, %s790_s18 }
   0xb   : > { %p27_p1 = scmp.eq.s32.totalorder %s26_s24, 0  ;;  %p37_p2 = scmp.eq.s32.totalorder %s798_s20, 0 }
   0xc   : > { %p42_p3 = scmp.ne.s32.totalorder %s790_s18, %s786_s17  ;;  %p1041_p4 = scmp.eq.s32.totalorder %s857_s3, 0 }
   0xd   : > { %s873_s25 = scalar_select %p27_p1, %s794_s19, %s29_s23  }
   0xe   : > { %p875_p5 = por %p37_p2, %p36_p0  ;;  %p881_p6 = por %p1041_p4, %p42_p3 }
   0xf   : > { %p129_p7 = scmp.eq.s32.totalorder %s857_s3, 1  ;;  %p135_p8 = scmp.eq.s32.totalorder %s564_s21, 1 }
  0x10   : > { %s1047_s27 = scalar_select %p881_p6, 1, 0 }
  0x11   : > { %p565_p9 = scmp.ge.s32.totalorder %s798_s20, 1  ;;  %p142_p10 = scmp.lt.s32.totalorder %s798_s20, 3 }
  0x12   : > { %p888_p11 = por %p129_p7, %p36_p0  ;;  %p892_p12 = por %p135_p8, %p42_p3 }
  0x13   : > { %p896_p13 = pnand %p565_p9, %p142_p10  ;;  %s800_s5 = smov [#allocation6]  }
  0x14   : > { %s1048_s28 = scalar_select %p888_p11, 1, 0 }
  0x15   : > { %s1049_s29 = scalar_select %p892_p12, 1, 0 }
  0x16   : > { %s1050_s30 = scalar_select %p896_p13, 1, 0 }
  0x17   : > { %p612_p2 = pneg %p896_p13  ;;  %s155_s6 = sshll.u32 %s800_s5, 4  ;;  %s156_s6 = int_to_ptr.vmem [resolvable:$true] %s155_s6 }
  0x18   : > { %p625_p4 = scmp.lt.s32.totalorder %s798_s20, 2  ;;  %p1051_p0 = scmp.eq.s32.totalorder %s857_s3, 0 }
  0x19   : > { %s172_s8 = sand.u32 1, %s794_s19   ;;  %s670_s13 = scalar_lea.hbm %s1037_s1, 128 }
  0x1a   : > { %p906_p7 = pnand %p612_p2, %p1051_p0  ;;  %p913_p3 = pnand %p625_p4, %p875_p5 }
  0x1b   : > { %s602_s10 = smul.u32 40, %s172_s8  ;;  %p671_p8 = scmp.ne.s32.totalorder %s1037_s1, %s670_s13 }
  0x1c   : > { %s1053_s9 = scalar_select %p913_p3, 1, 0 }
  0x1d   : > { %p672_p9 = pneg %p906_p7  ;;  %p677_p4 = scmp.lt.u32.totalorder %s670_s13, %s1037_s1 }
  0x1f   : > { %p673_p10 = pnand %p672_p9, %p671_p8 }
  0x21   : > { %p674_p2 = pneg %p673_p10 }
  0x23   : > { %p679_p5 = pnand %p677_p4, %p674_p2 }
  0x25   : > { %682 = shalt.err (!%p679_p5)
}
  0x26   : > { %s683_s23 = scalar_lea.vmem %s156_s6, 128  ;;  %p691_p11 = scmp.lt.s32.totalorder %s156_s6, %s156_s6 }
  0x27   : > { %p684_p0 = scmp.ne.s32.totalorder %s156_s6, %s683_s23  ;;  %p692_p6 = scmp.lt.s32.totalorder %s683_s23, %s683_s23 }
  0x29   : > { %p686_p1 = pnand %p684_p0, %p672_p9  ;;  %p693_p13 = por %p692_p6, %p691_p11 }
  0x2b   : > { %p687_p12 = pneg %p686_p1 }
  0x2d   : > { %p694_p3 = pnand %p693_p13, %p687_p12 }
  0x2f   : > { %697 = shalt.err (!%p694_p3)
}
  0x30   : > { %615 = dma.hbm_to_vmem [thread:$0]  (!%p906_p7), %s1037_s1, 128, %s156_s6, [#allocation7]  }
  0x31   : > { %s580_s5 = sshll.u32 %s798_s20, 7  ;;  %s176_s11 = scalar_lea.vmem [#allocation3], %s602_s10 }
  0x32   : > { %s183_s12 = sshll.u32 %s176_s11, 4  ;;  %s937_s15 = scalar_lea.hbm %s1036_s0, %s580_s5  ;;  %s939_s12 = int_to_ptr.vmem [resolvable:$true] %s183_s12 }
  0x33   : > { %s941_s7 = scalar_lea.sflag [#allocation4], %s172_s8  ;;  %s698_s16 = scalar_lea.hbm %s937_s15, 640 }
  0x34   : > { %p699_p6 = scmp.ne.s32.totalorder %s937_s15, %s698_s16  ;;  %p1054_p11 = scmp.ne.s32.totalorder %s1053_s9, 0 }
  0x35   : > { %s703_s21 = scalar_lea.hbm %s1036_s0, 1280  ;;  %p704_p7 = scmp.lt.u32.totalorder %s937_s15, %s1036_s0 }
  0x36   : > { %p700_p12 = pneg %p1054_p11  ;;  %p705_p3 = scmp.lt.u32.totalorder %s703_s21, %s698_s16 }
  0x37   : > { %p707_p9 = scmp.lt.u32.totalorder %s698_s16, %s937_s15 }
  0x38   : > { %p701_p13 = pnand %p700_p12, %p699_p6  ;;  %p706_p8 = por %p705_p3, %p704_p7 }
  0x3a   : > { %p702_p1 = pneg %p701_p13  ;;  %p708_p10 = por %p707_p9, %p706_p8 }
  0x3c   : > { %p709_p2 = pnand %p708_p10, %p702_p1 }
  0x3e   : > { %712 = shalt.err (!%p709_p2)
}
  0x3f   : > { %s713_s8 = scalar_lea.vmem %s939_s12, 640  ;;  %s801_s26 = smov [#allocation3]  }
  0x40   : > { %p714_p4 = scmp.ne.s32.totalorder %s939_s12, %s713_s8  ;;  %s718_s5 = sshll.u32 %s801_s26, 4  ;;  %s719_s5 = int_to_ptr.vmem [resolvable:$false] %s718_s5 }
  0x41   : > { %s720_s11 = scalar_lea.vmem %s719_s5, 1280  ;;  %p721_p6 = scmp.lt.s32.totalorder %s939_s12, %s719_s5 }
  0x42   : > { %p716_p5 = pnand %p714_p4, %p700_p12  ;;  %p722_p13 = scmp.lt.s32.totalorder %s720_s11, %s713_s8 }
  0x44   : > { %p717_p0 = pneg %p716_p5  ;;  %p723_p7 = por %p722_p13, %p721_p6 }
  0x46   : > { %p724_p3 = pnand %p723_p7, %p717_p0 }
  0x48   : > { %727 = shalt.err (!%p724_p3)
}
  0x49   : > { %s802_s13 = smov 256   ;;  %s803_s14 = smov 128  }
  0x4a   : > { %s804_s16 = smov 8   ;;  %p1055_p12 = scmp.ne.s32.totalorder %s1050_s30, 0 }
  0x4b   : > { %619 = dma.hbm_to_vmem [thread:$0]  (!%p1054_p11), %s937_s15, 640, %s939_s12, %s941_s7, %s802_s13, %s803_s14, %s804_s16  }
  0x4c   : > { %195 = sbr.rel (%p1055_p12) target bundleno = 360 (0x168), region = 36  ;;  %s972_s6 = sand.u32 (!%p1055_p12), 1, %s790_s18  }
  0x4d   : > { %s603_s10 = smul.u32 (!%p1055_p12), 40, %s972_s6  ;;  %s198_s21 = scalar_lea.sflag (!%p1055_p12), [#allocation4], %s972_s6 }
  0x4e   : > { %p1056_p1 = scmp.ne.s32.totalorder (!%p1055_p12), %s1047_s27, 0 }
  0x4f   : > { %s201_s23 = scalar_lea.vmem (!%p1055_p12), [#allocation3], %s603_s10 }
  0x53   : > { %773 = dma.done.wait (%p1056_p1), %s198_s21, 640  }
  0x54   : > { %775 = vsyncadd (%p1056_p1), %s198_s21, 4294966656  ;;  %p1057_p8 = scmp.eq.s32.totalorder %s857_s3, 0 }
  0x56   : > { %777 = dma.done.wait (%p1057_p8), [#allocation7], 128   ;;  %p1058_p11 = pmov %p1057_p8 }
  0x57   : > { %v805_v0 = vmov 0.0   ;;  %v232_v1 = vld [vmem:[%s201_s23] sm:$0xff]  ;;  %v233_v2 = vld [vmem:[%s201_s23 + $0x8] sm:$0xff]  ;;  %v234_v3 = vld [vmem:[%s201_s23 + $0x10] sm:$0xff]  ;;  %vm248_vm0 = vcmask 326656   ;;  %vm332_vm1 = vcmask 261120   ;;  %v452_v58 = vlaneseq }
  0x58   : > { %779 = vsyncadd (%p1058_p11), [#allocation7], 4294967168  ;;  %316 = vmatprep.mubr.f32.mxu0 %v805_v0  ;;  %400 = vmatprep.mubr.f32.mxu1 %v805_v0  ;;  %v598_v4 = vcombine.high %v232_v1, %v233_v2  ;;  %v599_v5 = vcombine.low %v232_v1, %v233_v2  ;;  %v240_v6 = vunpack.c.h.bf16 %v233_v2  ;;  %v242_v7 = vunpack.c.h.bf16 %v234_v3  ;;  %v235_v8 = vld [vmem:[%s201_s23 + $0x18] sm:$0xff]  ;;  %v236_v9 = vld [vmem:[%s201_s23 + $0x20] sm:$0xff]  ;;  %s442_s9 = sld [smem:[#allocation2]]  ;;  %s572_s12 = sshll.u32 %s972_s6, 1 }
  0x59   : > { %v600_v10 = vcombine.high %v234_v3, %v235_v8  ;;  %v239_v11 = vunpack.c.l.bf16 %v233_v2  ;;  %v241_v12 = vunpack.c.l.bf16 %v234_v3  ;;  %v601_v13 = vcombine.low %v234_v3, %v235_v8  ;;  %v247_v30 = vld [vmem:[#allocation6] sm:$0x1f]  ;;  %v323_v31 = vld [vmem:[%s1038_s2] sm:$0xf]  ;;  %s581_s15 = sshll.u32 %s857_s3, 5  ;;  %s229_s7 = scalar_lea.vmem [#allocation8], %s572_s12 }
  0x5a   : > { %583 = vmatprep.subr.bf16.mxu0 %v598_v4  ;;  %v325_v14 = vmul.f32 %v240_v6, %v240_v6  ;;  %v327_v15 = vmul.f32 %v242_v7, %v242_v7  ;;  %v244_v16 = vunpack.c.h.bf16 %v235_v8  ;;  %v246_v17 = vunpack.c.h.bf16 %v236_v9  ;;  %s484_s24 = sshll.u32 %s229_s7, 4  ;;  %s992_s5 = scalar_lea.hbm %s1040_s4, %s581_s15  ;;  %s994_s24 = int_to_ptr.vmem [resolvable:$true] %s484_s24 }
  0x5b   : > { %585 = vmatpush1.bf16.msra.mxu0 %v599_v5  ;;  %v324_v18 = vmul.f32 %v239_v11, %v239_v11  ;;  %v326_v19 = vmul.f32 %v241_v12, %v241_v12  ;;  %v243_v20 = vunpack.c.l.bf16 %v235_v8  ;;  %v245_v21 = vunpack.c.l.bf16 %v236_v9  ;;  %s470_s11 = scalar_lea.sflag [#allocation5], %s972_s6  ;;  %s728_s13 = scalar_lea.vmem %s994_s24, 32 }
  0x5c   : > { %v590_v22 = vpack.c.bf16 %v327_v15, %v325_v14  ;;  %587 = vmatprep.subr.bf16.mxu0 %v600_v10  ;;  %v329_v23 = vmul.f32 %v244_v16, %v244_v16  ;;  %v331_v24 = vmul.f32 %v246_v17, %v246_v17  ;;  %vm423_vm2 = vcmask 1043456   ;;  %p729_p9 = scmp.ne.s32.totalorder %s994_s24, %s728_s13  ;;  %p1059_p10 = scmp.ne.s32.totalorder %s1048_s28, 0 }
  0x5d   : > { %v592_v25 = vpack.c.bf16 %v326_v19, %v324_v18  ;;  %v328_v26 = vmul.f32 %v243_v20, %v243_v20  ;;  %v330_v27 = vmul.f32 %v245_v21, %v245_v21  ;;  %v806_v56 = vmov 1966171168   ;;  %s807_s3 = smov [#allocation8]  }
  0x5e   : > { %591 = vmatprep.subr.bf16.mxu1 %v590_v22  ;;  %v594_v28 = vpack.c.bf16 %v331_v24, %v329_v23  ;;  %v450_v57 = vunpack.c.l.s4 %v806_v56  ;;  %v443_v62 = vstv %s442_s9  ;;  %v453_v1 = vshrl.u32 %v452_v58, 7  ;;  %p730_p2 = pnand %p729_p9, %p1059_p10  ;;  %s732_s14 = sshll.u32 %s807_s3, 4  ;;  %s733_s14 = int_to_ptr.vmem [resolvable:$false] %s732_s14 }
  0x5f   : > { %593 = vmatpush1.bf16.msra.mxu1 %v592_v25  ;;  %589 = vmatpush1.bf16.msra.mxu0 %v601_v13  ;;  %v596_v29 = vpack.c.bf16 %v330_v27, %v328_v26  ;;  %vm466_vm3 = vcmp.lt.s32.totalorder %v452_v58, 256  ;;  %s734_s16 = scalar_lea.vmem %s733_s14, 64  ;;  %p735_p5 = scmp.lt.s32.totalorder %s994_s24, %s733_s14 }
  0x60   : > { %595 = vmatprep.subr.bf16.mxu1 %v594_v28  ;;  %260 = vmatprep.subr.mxu0 %v246_v17  ;;  %v451_v0 = vunpack.c.0.s8 %v450_v57  ;;  %p731_p4 = pneg %p730_p2  ;;  %p736_p0 = scmp.lt.s32.totalorder %s734_s16, %s728_s13 }
  0x62   : > { %v454_v6 = vsub.s32 %v451_v0, %v453_v1  ;;  %p737_p6 = por %p736_p0, %p735_p5 }
  0x63   : > { %597 = vmatpush1.bf16.msra.mxu1 %v596_v29  ;;  %261 = vmatpush1.msra.mxu0 %v245_v21 }
  0x64   : > { %573 = vmatmul.mubr.msk.f32.vlgmr.msra.gmra.mrb[0].mxu0 %vm248_vm0, %v247_v30  ;;  %p738_p13 = pnand %p737_p6, %p731_p4 }
  0x66   : > { %574 = vmatmul.mubr.msk.f32.vlgmr.msra.gmra.mrb[0].mxu1 %vm332_vm1, %v323_v31 }
 0x137   : > { %v318_v32 = vpop.f32.mrb[0].mxu0 }
 0x138   : > { %v407_v33 = vmul.f32 %v318_v32, %v318_v32  ;;  %v320_v34 = vpop.f32.mrb[1].mxu0 }
 0x139   : > { %v408_v35 = vmul.f32 %v320_v34, %v320_v34  ;;  %v402_v36 = vpop.f32.mrb[0].mxu1 }
 0x13a   : > { %v411_v37 = vrot.slane %v402_v36, 7  ;;  %v404_v38 = vpop.f32.mrb[1].mxu1 }
 0x13b   : > { %v412_v39 = vrot.slane %v404_v38, 7 }
 0x13c   : > { %v415_v40 = vsub.f32 %v407_v33, %v411_v37 }
 0x13d   : > { %v416_v41 = vsub.f32 %v408_v35, %v412_v39 }
 0x13e   : > { %v419_v42 = vrot.slane %v415_v40, 1 }
 0x13f   : > { %v420_v43 = vrot.slane %v416_v41, 1 }
 0x140   : > { %v424_v44 = vsel %vm423_vm2, %v419_v42, 0.0 }
 0x141   : > { %v425_v45 = vrot.slane %v424_v44, 4  ;;  %v431_v46 = vsel %vm423_vm2, %v420_v43, 0.0 }
 0x142   : > { %v432_v47 = vrot.slane %v431_v46, 4 }
 0x143   : > { %v426_v48 = vadd.f32 %v425_v45, %v424_v44 }
 0x144   : > { %v433_v49 = vadd.f32 %v432_v47, %v431_v46 }
 0x145   : > { %v427_v50 = vrot.slane %v426_v48, 2 }
 0x146   : > { %v434_v51 = vrot.slane %v433_v49, 2 }
 0x147   : > { %v428_v52 = vadd.f32 %v427_v50, %v426_v48 }
 0x148   : > { %v435_v53 = vadd.f32 %v434_v51, %v433_v49 }
 0x149   : > { %v429_v54 = vrot.slane %v428_v52, 1 }
 0x14a   : > { %v436_v55 = vrot.slane %v435_v53, 1 }
 0x14b   : > { %v430_v59 = vadd.f32 %v429_v54, %v428_v52 }
 0x14c   : > { %v437_v60 = vadd.f32 %v436_v55, %v435_v53 }
 0x14d   : > { %v438_v61 = vmul.f32 0.125, %v430_v59 }
 0x14e   : > { %v439_v63 = vmul.f32 0.125, %v437_v60 }
 0x14f   : > { %v440_v2 = vadd.f32 %v438_v61, %v318_v32 }
 0x150   : > { %v441_v3 = vadd.f32 %v439_v63, %v320_v34 }
 0x151   : > { %v444_v4 = vadd.f32 %v443_v62, %v440_v2 }
 0x152   : > { %v445_v5 = vadd.f32 %v443_v62, %v441_v3 }
 0x154   : > { %v448_v7 = vcombine.low %v444_v4, %v445_v5 }
 0x156   : > { %v455_v8 = vrot.slane %v448_v7, %v454_v6 }
 0x158   : > { %v462_v9 = vrot.slane %v455_v8, %v454_v6 }
 0x15a   : > { %468 = vst.msk [vmem:[%s229_s7] sm:$0x3] %vm466_vm3, %v462_v9 }
 0x15b   : > { %741 = shalt.err (!%p738_p13)
}
 0x15c   : > { %s742_s6 = scalar_lea.hbm %s992_s5, 32  ;;  %s746_s23 = scalar_lea.hbm %s1040_s4, 64 }
 0x15d   : > { %p743_p7 = scmp.ne.s32.totalorder %s992_s5, %s742_s6  ;;  %p747_p1 = scmp.lt.u32.totalorder %s992_s5, %s1040_s4 }
 0x15e   : > { %p748_p8 = scmp.lt.u32.totalorder %s746_s23, %s742_s6  ;;  %p750_p9 = scmp.lt.u32.totalorder %s742_s6, %s992_s5 }
 0x15f   : > { %p744_p3 = pnand %p743_p7, %p1059_p10 }
 0x160   : > { %p749_p11 = por %p748_p8, %p747_p1 }
 0x161   : > { %p745_p12 = pneg %p744_p3 }
 0x162   : > { %p751_p2 = por %p750_p9, %p749_p11 }
 0x164   : > { %p752_p4 = pnand %p751_p2, %p745_p12 }
 0x166   : > { %755 = shalt.err (!%p752_p4)
}
 0x167   : > { %610 = dma.vmem_to_hbm [thread:$0]  (%p1059_p10), %s994_s24, 32, %s992_s5, %s470_s11  }
 0x168 PF: > { %s496_s9 = sand.u32 1, %s786_s17   ;;  %p1060_p5 = scmp.ne.s32.totalorder %s1049_s29, 0 }
 0x169   : > { %p1061_p0 = scmp.ge.s32.totalorder %s798_s20, 2  ;;  %s497_s12 = scalar_lea.sflag [#allocation5], %s496_s9 }
 0x16b   : > { %p621_p6 = pnand %p1061_p0, %p1060_p5 }
 0x16d   : > { %781 = dma.done.wait (!%p621_p6), %s497_s12, 32  }
 0x16e   : > { %783 = vsyncadd (!%p621_p6), %s497_s12, 4294967264  ;;  %p19_p13 = scmp.ge.s32.totalorder %s861_s22, 4   ;;  %s1062_s17 = smov %s790_s18 }
 0x16f   : > { %s1063_s18 = smov %s794_s19  ;;  %s1064_s19 = smov %s873_s25 }
 0x170   : > { %s1065_s20 = smov %s861_s22  ;;  %21 = sbr.rel (!%p19_p13) target bundleno = 8 (0x8), region = 85 }
 0x177   :  { %502 = vsyncpa [#allocation4], 1 }
 0x178   :  { %504 = vsyncpa [#allocation4 + $0x1], 1 }
 0x179   :  { %505 = vsyncpa [#allocation7], 1 }
 0x17a   :  { %506 = vsyncpa [#allocation5], 1 }
 0x17b   :  { %508 = vsyncpa [#allocation5 + $0x1], 1 }

</bundles_post_ra>
